<compile_context>
chip_gen: v5e
topology: v5e:2x2
jax: 0.10.0
libtpu: 0.0.40
codegen_flags: <defaults>
</compile_context>

<pallas_src>
import functools

import jax
import jax.numpy as jnp
from jax.experimental import pallas as pl
from jax.experimental.pallas import tpu as pltpu

# ---- small, SA_module-consistent configuration -------------------------------------
B = 2              # batch
N = 64             # num_points
IN_PLANES = 32
REL_PLANES = 8
MID_PLANES = 32
OUT_PLANES = 32    # must equal IN_PLANES (residual add)
SHARE = 8          # share_planes
K = 16             # k neighbours


def _full_spec(a):
    """Whole-array block (grid=(1,))."""
    return pl.BlockSpec(a.shape, lambda i: (0,) * a.ndim)


# ------------------------------- stage 1: projection ---------------------------------
def project_kernel(x_ref, w23_ref, b23_ref, y_ref):
    """y = [W2; W3] @ relu(x) + [b2; b3]   (channel-major, one MXU matmul).

    x_ref   : (Cin, B*N)      f32
    w23_ref : (rel+mid, Cin)  bf16
    b23_ref : (rel+mid, 1)    f32
    y_ref   : (rel+mid, B*N)  f32
    """
    xr = jnp.maximum(x_ref[...], 0.0).astype(jnp.bfloat16)
    y_ref[...] = (jnp.dot(w23_ref[...], xr, preferred_element_type=jnp.float32)
                  + b23_ref[...])


# ----------------------------- stage 2: attention + out ------------------------------
def sa_attn_kernel(x_ref, xg2_ref, xg3_ref,
                   w1_ref, b1_ref, wa1_ref, wa2_ref, wb_ref, bb_ref,
                   sel_ref, wo_ref, bo_ref, out_ref, *, share):
    """Self-attention aggregation, channel-major (points on lanes).

    x_ref   : (Cin, M)     f32   pre-activation input (residual + conv1 input)
    xg2_ref : (rel*K, M)   f32   gathered conv2 features, row = r*K + kk (torch order)
    xg3_ref : (mid*K, M)   f32   gathered conv3 features, row = c*K + kk (torch order)
    sel_ref : (ms, ms*K)   bf16  0/1 selector summing the K neighbours of one channel
    out_ref : (Cout, M)    f32   Cout == Cin; 128-lane dense store
    """
    f32, bf16 = jnp.float32, jnp.bfloat16
    gsz = wb_ref.shape[0]              # ms * K rows of xg3 / watt per share group

    x = x_ref[...]                                        # (Cin, M) f32
    xr = jnp.maximum(x, 0.0)

    # conv1:  y1 = W1 @ relu(x) + b1                                       -> (rel, M)
    y1 = jnp.dot(w1_ref[...], xr, preferred_element_type=f32) + b1_ref[...]

    # conv_w[0:2] (ReLU -> 1x1, no bias), split into the x1 part and the gathered part;
    # the gathered operand is the big one (rel*K deep) -> bf16 on the MXU.
    h = (jnp.dot(wa1_ref[...], jnp.maximum(y1, 0.0), preferred_element_type=f32)
         + jnp.dot(wa2_ref[...], jnp.maximum(xg2_ref[...], 0.0).astype(bf16),
                   preferred_element_type=f32))                            # (ms, M)

    # conv_w[2:4] (ReLU -> 1x1 + bias): attention logits, row = c1*K + kk  -> (ms*K, M)
    watt = (jnp.dot(wb_ref[...], jnp.maximum(h, 0.0), preferred_element_type=f32)
            + bb_ref[...])

    # out[c] = sum_k watt[(c % ms)*K + k] * x3[c*K + k] : the share_planes repeat means
    # every group of `ms` consecutive output channels reuses the same `watt`.  Process
    # one group at a time (live set stays ~16 vregs -- no spill of two (K*mid, M) f32
    # tensors) and reduce over K with a tiny 0/1 selector matmul on the MXU.
    aggs = []
    for s in range(share):                                # static unroll, share == 8
        x3_s = xg3_ref[s * gsz:(s + 1) * gsz, :]          # (ms*K, M) f32
        p_s = (watt * x3_s).astype(bf16)                  # multiply in f32, cast at MXU
        aggs.append(jnp.dot(sel_ref[...], p_s, preferred_element_type=f32))   # (ms, M)
    agg = jnp.concatenate(aggs, axis=0)                   # (mid, M)

    # ReLU -> conv_out -> residual
    out = (jnp.dot(wo_ref[...], jnp.maximum(agg, 0.0), preferred_element_type=f32)
           + bo_ref[...] + x)                             # (Cout, M)
    out_ref[...] = out.astype(out_ref.dtype)


def sa_module_pallas(x_nchw, idx, p):
    """x_nchw: (B, Cin, 1, N) f32; idx: (B, N, K) int32; p: torch-layout parameters."""
    Bb, Cin, _, Np = x_nchw.shape
    k = idx.shape[-1]
    rel = p["w1"].shape[0]
    mid = p["w3"].shape[0]
    cout = p["wo"].shape[0]
    ms = p["wa"].shape[0]
    share = mid // ms
    M = Bb * Np
    f32, bf16 = jnp.float32, jnp.bfloat16

    # channel-major, batch folded onto lanes:  x_cm[c, b*Np + n] = x[b, c, 0, n]
    x_cm = jnp.transpose(x_nchw[:, :, 0, :], (1, 0, 2)).reshape(Cin, M)

    # ---- stage 1: dense conv2/conv3 projection (1x1 conv commutes with the gather) ----
    w23 = jnp.concatenate([p["w2"], p["w3"]], axis=0).astype(bf16)     # (rel+mid, Cin)
    b23 = jnp.concatenate([p["b2"], p["b3"]])[:, None].astype(f32)     # (rel+mid, 1)
    y23 = pl.pallas_call(
        project_kernel,
        out_shape=jax.ShapeDtypeStruct((rel + mid, M), f32),
        grid=(1,),
        in_specs=[_full_spec(x_cm), _full_spec(w23), _full_spec(b23)],
        out_specs=pl.BlockSpec((rel + mid, M), lambda i: (0, 0)),
        compiler_params=pltpu.CompilerParams(dimension_semantics=("arbitrary",)),
    )(x_cm, w23, b23)

    # ---- k-NN gather of the projected features (plain JAX glue) -----------------------
    # TODO(synk): move the dynamic gather in-kernel at production N (VMEM-resident y23 +
    # scalar-prefetched idx / per-row DMA); here it stays in XLA.
    fid = idx.astype(jnp.int32) + (jnp.arange(Bb, dtype=jnp.int32) * Np)[:, None, None]
    fi = jnp.transpose(fid, (2, 0, 1)).reshape(k, M)       # (K, M) flat point index
    xg2 = y23[:rel][:, fi].reshape(rel * k, M)             # row = r*K + kk (torch order)
    xg3 = y23[rel:][:, fi].reshape(mid * k, M)             # row = c*K + kk (torch order)

    # ---- stage 2: attention + output ---------------------------------------------------
    sel = jnp.kron(jnp.eye(ms, dtype=f32),
                   jnp.ones((1, k), dtype=f32)).astype(bf16)           # (ms, ms*K) 0/1
    args = (x_cm, xg2, xg3,
            p["w1"].astype(f32), p["b1"][:, None].astype(f32),
            p["wa"][:, :rel].astype(f32), p["wa"][:, rel:].astype(bf16),
            p["wb"].astype(f32), p["bb"][:, None].astype(f32),
            sel, p["wo"].astype(f32), p["bo"][:, None].astype(f32))
    out_cm = pl.pallas_call(
        functools.partial(sa_attn_kernel, share=share),
        out_shape=jax.ShapeDtypeStruct((cout, M), f32),
        grid=(1,),
        in_specs=[_full_spec(a) for a in args],
        out_specs=pl.BlockSpec((cout, M), lambda i: (0, 0)),
        compiler_params=pltpu.CompilerParams(dimension_semantics=("arbitrary",)),
    )(*args)

    # back to NCHW (B, Cout, 1, N): only the tiny B axis gets interleaved here; the
    # kernel already stored the output lane-dense as (Cout, B*N).
    return out_cm.reshape(cout, Bb, Np).transpose(1, 0, 2)[:, :, None, :]


# ---------------- pure-JAX reference (mirrors the PyTorch forward, NCHW) -------------
def _conv1x1(x, w, b=None):
    y = jnp.einsum("oc,bchw->bohw", w, x, precision=jax.lax.Precision.HIGHEST)
    if b is not None:
        y = y + b[None, :, None, None]
    return y


def sa_reference(x, idx, p, share, k):
    Bb, Cin, _, Np = x.shape
    identity = x
    xr = jax.nn.relu(x)
    xsq = xr[:, :, 0, :]                                           # (B, C, N)
    gathered = jax.vmap(lambda xb, ib: xb[:, ib])(xsq, idx)        # (B, C, N, K)
    xn = jnp.transpose(gathered, (0, 1, 3, 2))                     # (B, C, K, N)
    x1 = _conv1x1(xr, p["w1"], p["b1"])
    x2 = _conv1x1(xn, p["w2"], p["b2"])
    x3 = _conv1x1(xn, p["w3"], p["b3"])
    x2 = x2.reshape(Bb, -1, 1, Np)
    cat = jnp.concatenate([x1, x2], axis=1)
    h = _conv1x1(jax.nn.relu(cat), p["wa"])
    wv = _conv1x1(jax.nn.relu(h), p["wb"], p["bb"])
    w = wv.reshape(Bb, -1, k, Np)
    w = jnp.tile(w, (1, share, 1, 1))
    out = jnp.sum(w * x3, axis=2, keepdims=True)
    out = _conv1x1(jax.nn.relu(out), p["wo"], p["bo"])
    return out + identity


if __name__ == "__main__":
    key = jax.random.PRNGKey(0)
    ks = jax.random.split(key, 13)
    x = jax.random.normal(ks[0], (B, IN_PLANES, 1, N), dtype=jnp.float32)
    idx = jax.random.randint(ks[1], (B, N, K), 0, N, dtype=jnp.int32)

    # deterministic synthetic parameters (torch Conv2d layout: (Cout, Cin) for 1x1)
    p = {
        "w1": 0.1 * jax.random.normal(ks[2], (REL_PLANES, IN_PLANES), jnp.float32),
        "b1": 0.1 * jax.random.normal(ks[3], (REL_PLANES,), jnp.float32),
        "w2": 0.1 * jax.random.normal(ks[4], (REL_PLANES, IN_PLANES), jnp.float32),
        "b2": 0.1 * jax.random.normal(ks[5], (REL_PLANES,), jnp.float32),
        "w3": 0.1 * jax.random.normal(ks[6], (MID_PLANES, IN_PLANES), jnp.float32),
        "b3": 0.1 * jax.random.normal(ks[7], (MID_PLANES,), jnp.float32),
        "wa": 0.1 * jax.random.normal(ks[8], (MID_PLANES // SHARE, REL_PLANES * (K + 1)),
                                      jnp.float32),                         # no bias
        "wb": 0.1 * jax.random.normal(ks[9], (K * (MID_PLANES // SHARE),
                                              MID_PLANES // SHARE), jnp.float32),
        "bb": 0.1 * jax.random.normal(ks[10], (K * (MID_PLANES // SHARE),), jnp.float32),
        "wo": 0.1 * jax.random.normal(ks[11], (OUT_PLANES, MID_PLANES), jnp.float32),
        "bo": 0.1 * jax.random.normal(ks[12], (OUT_PLANES,), jnp.float32),
    }

    out = sa_module_pallas(x, idx, p)
    out = jax.block_until_ready(out)

    ref = sa_reference(x, idx, p, SHARE, K)
    assert out.shape == (B, OUT_PLANES, 1, N), out.shape
    # bf16 MXU operands on the projection / gathered-feature / K-reduction matmuls give
    # ~5e-3 max abs error vs. the f32 reference; assert with margin.
    err = float(jnp.max(jnp.abs(out - ref)))
    assert err < 2e-2, f"max abs err {err}"
    print("KERNEL_OK")
</pallas_src>

<mosaic_0001>
module attributes {stable_mosaic.version = 11 : i64} {
  func.func @project_kernel(%arg0: i32, %arg1: memref<32x128xf32, #tpu.memory_space<vmem>>, %arg2: memref<40x32xbf16, #tpu.memory_space<vmem>>, %arg3: memref<40x1xf32, #tpu.memory_space<vmem>>, %arg4: memref<40x128xf32, #tpu.memory_space<vmem>>) attributes {dimension_semantics = [#tpu.dimension_semantics<arbitrary>], iteration_bounds = array<i64: 1>, scalar_prefetch = 0 : i64, scratch_operands = 0 : i64, tpu.core_type = #tpu.core_type<tc>, window_params = [{pipeline_mode = #tpu.pipeline_mode<synchronous>, transform_indices = @transform_0, window_bounds = array<i64: 32, 128>}, {pipeline_mode = #tpu.pipeline_mode<synchronous>, transform_indices = @transform_1, window_bounds = array<i64: 40, 32>}, {pipeline_mode = #tpu.pipeline_mode<synchronous>, transform_indices = @transform_2, window_bounds = array<i64: 40, 1>}, {pipeline_mode = #tpu.pipeline_mode<synchronous>, transform_indices = @transform_3, window_bounds = array<i64: 40, 128>}]} {
    %c0 = arith.constant 0 : index
    %c0_0 = arith.constant 0 : index
    %0 = vector.load %arg1[%c0, %c0_0] : memref<32x128xf32, #tpu.memory_space<vmem>>, vector<32x128xf32>
    %cst = arith.constant 0.000000e+00 : f32
    %1 = vector.broadcast %cst : f32 to vector<32x128xf32>
    %2 = arith.maximumf %0, %1 : vector<32x128xf32>
    %3 = arith.truncf %2 : vector<32x128xf32> to vector<32x128xbf16>
    %c0_1 = arith.constant 0 : index
    %c0_2 = arith.constant 0 : index
    %4 = vector.load %arg2[%c0_1, %c0_2] : memref<40x32xbf16, #tpu.memory_space<vmem>>, vector<40x32xbf16>
    %cst_3 = arith.constant dense<0.000000e+00> : vector<40x128xf32>
    %5 = tpu.matmul %4, %3, %cst_3 {dimension_numbers = #tpu.dot_dimension_numbers<[1], [0], [0], [1], [0, 0, 1, 1], [], []>} : vector<40x32xbf16>, vector<32x128xbf16>, vector<40x128xf32> -> vector<40x128xf32>
    %c0_4 = arith.constant 0 : index
    %c0_5 = arith.constant 0 : index
    %6 = vector.load %arg3[%c0_4, %c0_5] : memref<40x1xf32, #tpu.memory_space<vmem>>, vector<40x1xf32>
    %7 = vector.broadcast %6 : vector<40x1xf32> to vector<40x128xf32>
    %8 = arith.addf %5, %7 : vector<40x128xf32>
    %c0_6 = arith.constant 0 : index
    %c0_7 = arith.constant 0 : index
    %9 = vector.load %arg4[%c0_6, %c0_7] : memref<40x128xf32, #tpu.memory_space<vmem>>, vector<40x128xf32>
    tpu.vector_store %arg4[%c0_6, %c0_7], %8 {strides = array<i32>} : memref<40x128xf32, #tpu.memory_space<vmem>>, vector<40x128xf32>,
    return
  }
  func.func @transform_0(%arg0: i32) -> (i32, i32) {
    %c0_i32 = arith.constant 0 : i32
    %c0_i32_0 = arith.constant 0 : i32
    %c0_i32_1 = arith.constant 0 : i32
    return %c0_i32, %c0_i32_0 : i32, i32
  }
  func.func @transform_1(%arg0: i32) -> (i32, i32) {
    %c0_i32 = arith.constant 0 : i32
    %c0_i32_0 = arith.constant 0 : i32
    %c0_i32_1 = arith.constant 0 : i32
    return %c0_i32, %c0_i32_0 : i32, i32
  }
  func.func @transform_2(%arg0: i32) -> (i32, i32) {
    %c0_i32 = arith.constant 0 : i32
    %c0_i32_0 = arith.constant 0 : i32
    %c0_i32_1 = arith.constant 0 : i32
    return %c0_i32, %c0_i32_0 : i32, i32
  }
  func.func @transform_3(%arg0: i32) -> (i32, i32) {
    %c0_i32 = arith.constant 0 : i32
    %c0_i32_0 = arith.constant 0 : i32
    %c0_i32_1 = arith.constant 0 : i32
    return %c0_i32, %c0_i32_0 : i32, i32
  }
}

</mosaic_0001>

<bundles_post_ra>
// kernel: tpu_custom_call.1
= control target key start
LH: loop header
LB: loop body
LE: loop exit
PB: predicated region body
PF: predicated region fallthrough
CT: control target
= control target key end

     0   :  { %v180_v7 = vmov 0   ;;  %s243_s0 = inlined_call_operand.vmem [shape: f32[32,128], index: 0, kind: input, shape index: {}]   ;;  %s244_s1 = inlined_call_operand.vmem [shape: bf16[40,32], index: 1, kind: input, shape index: {}]   ;;  %s245_s2 = inlined_call_operand.vmem [shape: f32[40,1], index: 2, kind: input, shape index: {}]   ;;  %s246_s3 = inlined_call_operand.hbm [shape: f32[40,128], index: 3, kind: output, shape index: {}]  }
   0x1   :  { %v18_v0 = vld [vmem:[%s243_s0 + $0x10] sm:$0xff]  ;;  %v19_v1 = vld [vmem:[%s243_s0 + $0x18] sm:$0xff]  ;;  %v16_v2 = vld [vmem:[%s243_s0] sm:$0xff]  ;;  %152 = vset.pattern.permute.xlu1 %v180_v7  ;;  %151 = vset.pattern.permute.xlu0 %v180_v7 }
   0x2   :  { %v22_v3 = vmax.f32 %v18_v0, 0.0  ;;  %v23_v4 = vmax.f32 %v19_v1, 0.0  ;;  %v17_v5 = vld [vmem:[%s243_s0 + $0x8] sm:$0xff]  ;;  %v20_v6 = vmax.f32 %v16_v2, 0.0  ;;  %v30_v9 = vld [vmem:[%s244_s1 + $0x10] sm:$0xf]  ;;  %153 = vset.pattern.permute.xlu2 %v180_v7 }
   0x3   :  { %v21_v8 = vmax.f32 %v17_v5, 0.0  ;;  %v33_v10 = vld [vmem:[%s245_s2 + $0x10] sm:$0xff]  ;;  %v31_v11 = vld [vmem:[%s245_s2] sm:$0xff] }
   0x4   :  { %v25_v12 = vpack.c.bf16 %v23_v4, %v22_v3  ;;  %48 = vperm.xlu1 %152, %v33_v10   ;;  %38 = vperm.xlu0 %151, %v31_v11   ;;  %v35_v13 = vld [vmem:[%s245_s2 + $0x20] sm:$0xff] }
   0x5   :  { %58 = vperm.xlu2 %153, %v35_v13  }
   0x6   :  { %8 = vsyncpa [#allocation3], 0  ;;  %90 = vmatpush.bf16.msra.mxu0 %v25_v12  ;;  %143 = vmatpush.bf16.msra.mxu1 %v25_v12  ;;  %v24_v14 = vpack.c.bf16 %v21_v8, %v20_v6  ;;  %v70_v15 = vunpack.c.l.b16 %v30_v9  ;;  %v141_v16 = vld [vmem:[%s244_s1] sm:$0xff]  ;;  %v142_v17 = vld [vmem:[%s244_s1 + $0x8] sm:$0xff]  ;;  %vm74_vm0 = vcmask 261120   ;;  %s181_s1 = smov [#allocation2]  }
   0x7   :  { %144 = vmatpush.bf16.msra.mxu2 %v25_v12  ;;  %v34_v18 = vld [vmem:[%s245_s2 + $0x18] sm:$0xff]  ;;  %v32_v19 = vld [vmem:[%s245_s2 + $0x8] sm:$0xff]  ;;  %s116_s2 = sshll.u32 %s181_s1, 4  ;;  %s118_s10 = sshll.u32 %s246_s3, 4  ;;  %s117_s2 = int_to_ptr.vmem [resolvable:$true] %s116_s2  ;;  %s119_s10 = int_to_ptr.hbm [resolvable:$true] %s118_s10 }
   0x8   :  { %v73_v20 = vpack.c.b16 %v70_v15, %v70_v15  ;;  %s182_s11 = smov 128   ;;  %s183_s12 = smov 8  }
   0xa   :  { %91 = vmatpush.bf16.msra.mxu0 %v24_v14  ;;  %145 = vmatpush.bf16.msra.mxu1 %v24_v14 }
   0xb   :  { %146 = vmatpush.bf16.msra.mxu2 %v24_v14 }
   0xc   :  { %53 = vperm.xlu1 %152, %v34_v18   ;;  %43 = vperm.xlu0 %151, %v32_v19  }
   0xd   :  { %138 = vmatmul.msk.bf16.vlgmr.msra.gmra.mxu0 %vm74_vm0, %v141_v16  ;;  %139 = vmatmul.msk.bf16.vlgmr.msra.gmra.mxu1 %vm74_vm0, %v142_v17 }
   0xe   :  { %140 = vmatmul.msk.bf16.vlgmr.msra.gmra.mxu2 %vm74_vm0, %v73_v20 }
  0x5f   :  { %v59_v27 = vpop.permute.xlu2 %58 }
  0x76   :  { %v49_v21 = vpop.permute.xlu1 %48  ;;  %v39_v22 = vpop.permute.xlu0 %38 }
  0x7e   :  { %v54_v28 = vpop.permute.xlu1 %53  ;;  %v44_v29 = vpop.permute.xlu0 %43 }
  0x8a   :  { %v93_v23 = vpop.f32.mrf.mxu0  ;;  %v98_v24 = vpop.f32.mrf.mxu1 }
  0x8b   :  { %v94_v25 = vadd.f32 %v93_v23, %v39_v22  ;;  %v99_v26 = vadd.f32 %v98_v24, %v49_v21 }
  0x8d   :  { %107 = vst [vmem:[#allocation2] sm:$0xff] %v94_v25 }
  0x8e   :  { %109 = vst [vmem:[#allocation2 + $0x10] sm:$0xff] %v99_v26 }
  0x91   :  { %v103_v30 = vpop.f32.mrf.mxu2 }
  0x92   :  { %v104_v31 = vadd.f32 %v103_v30, %v59_v27  ;;  %v95_v32 = vpop.f32.mrf.mxu0  ;;  %v100_v33 = vpop.f32.mrf.mxu1 }
  0x93   :  { %v96_v34 = vadd.f32 %v95_v32, %v44_v29  ;;  %v101_v35 = vadd.f32 %v100_v33, %v54_v28 }
  0x94   :  { %111 = vst [vmem:[#allocation2 + $0x20] sm:$0xff] %v104_v31 }
  0x95   :  { %108 = vst [vmem:[#allocation2 + $0x8] sm:$0xff] %v96_v34 }
  0x96   :  { %110 = vst [vmem:[#allocation2 + $0x18] sm:$0xff] %v101_v35 }
  0x97   :  { %124 = dma.vmem_to_hbm [thread:$0]  %s117_s2, 640, %s119_s10, [#allocation3], %s182_s11, %s182_s11, %s183_s12  }
  0x99   :  { %v105_v36 = vpop.f32.mrf.mxu2 }
  0x9a   :  { %178 = dma.done.wait [#allocation3], 640  }
  0x9b   :  { %179 = vsyncadd [#allocation3], 4294966656 }
  0x9c   :  { %129 = vsyncpa [#allocation3], 1 }

</bundles_post_ra>
